<compile_context>
chip_gen: v5e
topology: v5e:2x2
jax: 0.10.0
libtpu: 0.0.40
codegen_flags: <defaults>
</compile_context>

<pallas_src>
import functools

import jax
import jax.numpy as jnp
from jax.experimental import pallas as pl
from jax.experimental.pallas import tpu as pltpu

_LANES = 128
_TARGET_BLOCK_BYTES = 1 << 20  # ~1 MiB per input block (x 2 buffers x 3 streams)


def _first_deriv_kernel(a_ref, b_ref, o_ref, *, coef):
    # out = coef * (a - b); single fused elementwise VPU pass, f32 accumulation.
    a = a_ref[...]
    b = b_ref[...]
    if a.dtype != jnp.float32:
        a = a.astype(jnp.float32)
        b = b.astype(jnp.float32)
    o_ref[...] = (coef * (a - b)).astype(o_ref.dtype)


def _choose_lane_width(total):
    """Largest lane-dense width that divides the element count (else pad to 128)."""
    for lw in (1024, 512, 256, 128):
        if total % lw == 0:
            return lw, 0
    pad = (-total) % _LANES
    return _LANES, pad


def _combine_fields(plus, minus, dx):
    """Elementwise 0.5/dx * (plus - minus) as a tiled Pallas TPU kernel."""
    assert plus.shape == minus.shape
    assert plus.dtype == minus.dtype
    orig_shape = plus.shape
    dtype = plus.dtype
    coef = float(0.5 / dx)  # compile-time constant; folds into the vmul
    itemsize = jnp.dtype(dtype).itemsize

    total = int(plus.size)
    lane_w, pad = _choose_lane_width(total)
    padded = total + pad
    rows = padded // lane_w

    def to_slab(x):
        x = x.reshape(-1)
        if pad:  # fallback only; common NCHW sizes take the no-copy path
            x = jnp.pad(x, (0, pad))
        return x.reshape(rows, lane_w)

    a = to_slab(plus)
    b = to_slab(minus)

    # Pick a block of ~1 MiB per stream; full-extent block if it all fits.
    rows_per_block = max(1, _TARGET_BLOCK_BYTES // (lane_w * itemsize))
    if rows <= rows_per_block:
        block_rows = rows  # full-extent block (any row count is legal)
    else:
        block_rows = max(8, (rows_per_block // 8) * 8)  # multiple of 8

    grid = (pl.cdiv(rows, block_rows),)
    block_spec = pl.BlockSpec((block_rows, lane_w), lambda i: (i, 0))

    cost = pl.CostEstimate(
        flops=2 * padded,
        transcendentals=0,
        bytes_accessed=3 * padded * itemsize,
    )

    out_slab = pl.pallas_call(
        functools.partial(_first_deriv_kernel, coef=coef),
        out_shape=jax.ShapeDtypeStruct((rows, lane_w), dtype),
        grid_spec=pltpu.PrefetchScalarGridSpec(
            num_scalar_prefetch=0,
            grid=grid,
            in_specs=[block_spec, block_spec],
            out_specs=pl.BlockSpec((block_rows, lane_w), lambda i: (i, 0)),
        ),
        compiler_params=pltpu.CompilerParams(
            dimension_semantics=("parallel",),
        ),
        cost_estimate=cost,
    )(a, b)

    out = out_slab.reshape(-1)
    if pad:
        out = out[:total]
    return out.reshape(orig_shape)


class FirstDerivSecondOrder:
    """JAX/Pallas port of the PyTorch module (no parameters)."""

    def __init__(self, var, indep_var, out_name):
        self.var = var
        self.indep_var = indep_var
        self.out_name = out_name

    def __call__(self, inputs, dx):
        plus = inputs[f"{self.var}>>{self.indep_var}::1"]
        minus = inputs[f"{self.var}>>{self.indep_var}::-1"]
        return {self.out_name: _combine_fields(plus, minus, dx)}


def _reference(inputs, var, indep_var, out_name, dx):
    out = (
        0.5 / dx * inputs[f"{var}>>{indep_var}::1"]
        + -0.5 / dx * inputs[f"{var}>>{indep_var}::-1"]
    )
    return {out_name: out}


if __name__ == "__main__":
    key = jax.random.PRNGKey(0)
    N, C, H, W = 2, 4, 16, 16  # NCHW field tensors
    dx = 0.1
    var, indep_var, out_name = "u", "x", "u__x"

    names = [f"{var}>>{indep_var}::1", f"{var}>>{indep_var}::-1"]
    keys = jax.random.split(key, len(names))
    inputs = {
        nm: jax.random.normal(k, (N, C, H, W), dtype=jnp.float32)
        for nm, k in zip(names, keys)
    }

    mod = FirstDerivSecondOrder(var, indep_var, out_name)
    out = mod(inputs, dx)
    jax.block_until_ready(out[out_name])

    ref = _reference(inputs, var, indep_var, out_name, dx)
    err = float(jnp.max(jnp.abs(out[out_name] - ref[out_name])))
    assert out[out_name].shape == (N, C, H, W)
    assert out[out_name].dtype == jnp.float32
    assert err < 1e-4, f"max abs error {err}"
    print("KERNEL_OK")
</pallas_src>

<mosaic_0001>
module attributes {stable_mosaic.version = 11 : i64} {
  func.func @_first_deriv_kernel(%arg0: i32, %arg1: memref<2x1024xf32, #tpu.memory_space<vmem>>, %arg2: memref<2x1024xf32, #tpu.memory_space<vmem>>, %arg3: memref<2x1024xf32, #tpu.memory_space<vmem>>) attributes {dimension_semantics = [#tpu.dimension_semantics<parallel>], iteration_bounds = array<i64: 1>, scalar_prefetch = 0 : i64, scratch_operands = 0 : i64, tpu.core_type = #tpu.core_type<tc>, window_params = [{transform_indices = @transform_0, window_bounds = array<i64: 2, 1024>}, {transform_indices = @transform_1, window_bounds = array<i64: 2, 1024>}, {transform_indices = @transform_2, window_bounds = array<i64: 2, 1024>}]} {
    %c0 = arith.constant 0 : index
    %c0_0 = arith.constant 0 : index
    %0 = vector.load %arg1[%c0, %c0_0] : memref<2x1024xf32, #tpu.memory_space<vmem>>, vector<2x1024xf32>
    %c0_1 = arith.constant 0 : index
    %c0_2 = arith.constant 0 : index
    %1 = vector.load %arg2[%c0_1, %c0_2] : memref<2x1024xf32, #tpu.memory_space<vmem>>, vector<2x1024xf32>
    %2 = arith.subf %0, %1 : vector<2x1024xf32>
    %cst = arith.constant 5.000000e+00 : f32
    %3 = vector.broadcast %cst : f32 to vector<2x1024xf32>
    %4 = arith.mulf %3, %2 : vector<2x1024xf32>
    %c0_3 = arith.constant 0 : index
    %c0_4 = arith.constant 0 : index
    %5 = vector.load %arg3[%c0_3, %c0_4] : memref<2x1024xf32, #tpu.memory_space<vmem>>, vector<2x1024xf32>
    tpu.vector_store %arg3[%c0_3, %c0_4], %4 {strides = array<i32>} : memref<2x1024xf32, #tpu.memory_space<vmem>>, vector<2x1024xf32>,
    return
  }
  func.func @transform_0(%arg0: i32) -> (i32, i32) {
    %c0_i32 = arith.constant 0 : i32
    %c0_i32_0 = arith.constant 0 : i32
    return %arg0, %c0_i32 : i32, i32
  }
  func.func @transform_1(%arg0: i32) -> (i32, i32) {
    %c0_i32 = arith.constant 0 : i32
    %c0_i32_0 = arith.constant 0 : i32
    return %arg0, %c0_i32 : i32, i32
  }
  func.func @transform_2(%arg0: i32) -> (i32, i32) {
    %c0_i32 = arith.constant 0 : i32
    %c0_i32_0 = arith.constant 0 : i32
    return %arg0, %c0_i32 : i32, i32
  }
}

</mosaic_0001>

<bundles_post_ra>
// kernel: tpu_custom_call.1
= control target key start
LH: loop header
LB: loop body
LE: loop exit
PB: predicated region body
PF: predicated region fallthrough
CT: control target
= control target key end

     0   :  { %7 = vsyncpa [#allocation3], 0  ;;  %s176_s0 = inlined_call_operand.hbm [shape: f32[2,1024], index: 0, kind: input, shape index: {}]   ;;  %s177_s1 = inlined_call_operand.hbm [shape: f32[2,1024], index: 1, kind: input, shape index: {}]   ;;  %s178_s2 = inlined_call_operand.hbm [shape: f32[2,1024], index: 2, kind: output, shape index: {}]  }
   0x1   :  { %8 = vsyncpa [#allocation6], 0 }
   0x2   :  { %9 = vsyncpa [#allocation4], 0  ;;  %s15_s11 = sshll.u32 %s176_s0, 4  ;;  %s149_s12 = smov [#allocation2]   ;;  %s16_s11 = int_to_ptr.hbm [resolvable:$true] %s15_s11 }
   0x3   :  { %s17_s13 = sshll.u32 %s149_s12, 4  ;;  %s26_s16 = sshll.u32 %s177_s1, 4  ;;  %s18_s13 = int_to_ptr.vmem [resolvable:$true] %s17_s13  ;;  %s27_s16 = int_to_ptr.hbm [resolvable:$true] %s26_s16 }
   0x4   :  { %20 = dma.hbm_to_vmem [thread:$0]  %s16_s11, 256, %s18_s13, [#allocation3]  }
   0x5   :  { %s150_s17 = smov [#allocation5]  }
   0x6   :  { %s28_s18 = sshll.u32 %s150_s17, 4  ;;  %s29_s18 = int_to_ptr.vmem [resolvable:$true] %s28_s18 }
   0x7   :  { %31 = dma.hbm_to_vmem [thread:$0]  %s27_s16, 256, %s29_s18, [#allocation6]  }
   0x8   :  { %143 = dma.done.wait [#allocation3], 256  }
   0x9   :  { %144 = vsyncadd [#allocation3], 4294967040 }
   0xa   :  { %145 = dma.done.wait [#allocation6], 256  }
   0xb   :  { %146 = vsyncadd [#allocation6], 4294967040  ;;  %v40_v0 = vld [vmem:[#allocation2] sm:$0xff]  ;;  %v42_v1 = vld [vmem:[#allocation5] sm:$0xff]  ;;  %s151_s0 = smov [#allocation7]   ;;  %s57_s1 = sshll.u32 %s178_s2, 4  ;;  %s58_s1 = int_to_ptr.hbm [resolvable:$true] %s57_s1 }
   0xc   :  { %v41_v2 = vld [vmem:[#allocation2 + $0x8] sm:$0xff]  ;;  %v44_v3 = vsub.f32 %v40_v0, %v42_v1  ;;  %v43_v4 = vld [vmem:[#allocation5 + $0x8] sm:$0xff]  ;;  %s55_s19 = sshll.u32 %s151_s0, 4  ;;  %s56_s19 = int_to_ptr.vmem [resolvable:$true] %s55_s19 }
   0xd   :  { %v45_v5 = vsub.f32 %v41_v2, %v43_v4 }
   0xe   :  { %v46_v6 = vmul.f32 5.0, %v44_v3 }
   0xf   :  { %v47_v7 = vmul.f32 5.0, %v45_v5 }
  0x10   :  { %48 = vst [vmem:[#allocation7] sm:$0xff] %v46_v6 }
  0x11   :  { %49 = vst [vmem:[#allocation7 + $0x8] sm:$0xff] %v47_v7 }
  0x12   :  { %60 = dma.vmem_to_hbm [thread:$0]  %s56_s19, 256, %s58_s1, [#allocation4]  }
  0x13   :  { %147 = dma.done.wait [#allocation4], 256  }
  0x14   :  { %148 = vsyncadd [#allocation4], 4294967040 }
  0x15   :  { %65 = vsyncpa [#allocation3], 1 }
  0x16   :  { %66 = vsyncpa [#allocation6], 1 }
  0x17   :  { %67 = vsyncpa [#allocation4], 1 }

</bundles_post_ra>
